<compile_context>
chip_gen: v6e
topology: v6e:2x2x1
jax: 0.10.0
libtpu: 0.0.40
codegen_flags: <defaults>
</compile_context>

<pallas_src>
import jax
import jax.numpy as jnp
from jax.experimental import pallas as pl
from jax.experimental.pallas import tpu as pltpu


def _cbow_onehot_kernel(idx_ref, tab_ref, o_ref):
    """One-hot-gather CBOW forward: a single MXU contraction per batch tile.

    idx_ref : VMEM int32 [bm, 4]       context word ids for this batch tile
    tab_ref : VMEM bf16  [4*voc, D]    pre-folded (codebook @ W_c.T) tables
    o_ref   : VMEM f32   [bm, D]       output tile
    """
    bm, n_ctx = idx_ref.shape
    four_voc, _ = tab_ref.shape
    voc = four_voc // n_ctx

    # Build the [bm, 4*voc] one-hot selector with vectorized compares on the
    # VPU.  Column (c*voc + w) is 1 iff idx[b, c] == w.  The four hot ranges
    # are disjoint so a sum combines them; everything stays on full lane-dense
    # tiles (no scalar reads, no masked stores).
    col = jax.lax.broadcasted_iota(jnp.int32, (bm, four_voc), 1)
    ids = idx_ref[...]                                     # [bm, 4]
    onehot = jnp.zeros((bm, four_voc), jnp.float32)
    for c in range(n_ctx):                                 # 4 compares + adds
        gid = ids[:, c:c + 1] + c * voc                    # [bm, 1]
        onehot = onehot + (col == gid).astype(jnp.float32)

    # Whole forward = ONE MXU pass: [bm, 4*voc] @ [4*voc, D], f32 accumulate.
    # The sum over the four context words is the K-reduction.
    o_ref[...] = jnp.dot(
        onehot.astype(tab_ref.dtype), tab_ref[...],
        preferred_element_type=jnp.float32,
    ).astype(o_ref.dtype)


def prepare_params(codebook, w1, w2, w3, w4, weight_dtype=jnp.bfloat16):
    """One-time parameter folding (cache the result across forward calls).

    nn.Linear computes v @ W.T.  Because v_c = onehot_c @ codebook, the forward
    equals  sum_c onehot_c @ (codebook @ W_c.T).  We precompute each
    T_c = codebook @ W_c.T in f32, stack along the contraction axis to
    [4*voc, D] and cast to bf16 (halves HBM->VMEM traffic; the MXU still
    accumulates in f32).  Use weight_dtype=jnp.float32 if strict f32 numerics
    are required.  Note: parameter memory becomes 4*voc*D — for very large
    vocabularies keep the codebook in HBM and DMA-gather rows instead.
    """
    tables = [codebook @ w.T for w in (w1, w2, w3, w4)]    # each [voc, D], f32
    return jnp.concatenate(tables, axis=0).astype(weight_dtype)


@jax.jit
def cbow_forward(table, x1, x2, x4, x5):
    """Pallas implementation of CBOW.forward: one fused pallas_call."""
    four_voc, dim = table.shape
    voc = four_voc // 4
    b = x1.shape[0]

    # [B, 4] index matrix; clamp once here (hoisted out of the kernel).
    # PyTorch nn.Embedding would raise on out-of-range ids; we clamp instead.
    idx = jnp.stack([x1, x2, x4, x5], axis=1).astype(jnp.int32)
    idx = jnp.clip(idx, 0, voc - 1)

    # Pad batch to a sublane multiple and choose the batch tile: one block for
    # small B, 256-row tiles otherwise (parallel grid axis -> v7x megacore).
    if b <= 256:
        pad_b = ((b + 7) // 8) * 8
        bm = pad_b
    else:
        pad_b = ((b + 255) // 256) * 256
        bm = 256
    if pad_b != b:
        idx = jnp.pad(idx, ((0, pad_b - b), (0, 0)))

    out = pl.pallas_call(
        _cbow_onehot_kernel,
        out_shape=jax.ShapeDtypeStruct((pad_b, dim), jnp.float32),
        grid_spec=pltpu.PrefetchScalarGridSpec(
            num_scalar_prefetch=0,
            grid=(pad_b // bm,),
            in_specs=[
                pl.BlockSpec((bm, 4), lambda i: (i, 0)),           # indices
                pl.BlockSpec((four_voc, dim), lambda i: (0, 0)),   # folded table
            ],
            out_specs=pl.BlockSpec((bm, dim), lambda i: (i, 0)),
        ),
        compiler_params=pltpu.CompilerParams(
            dimension_semantics=("parallel",)),
    )(idx, table)
    return out[:b]


def cbow_reference(codebook, w1, w2, w3, w4, x1, x2, x4, x5):
    """Pure-JAX f32 reference matching the PyTorch module semantics."""
    v1 = codebook[x1]
    v2 = codebook[x2]
    v4 = codebook[x4]
    v5 = codebook[x5]
    return v1 @ w1.T + v2 @ w2.T + v4 @ w3.T + v5 @ w4.T


if __name__ == "__main__":
    voc_num = 64    # vocabulary size (small demo)
    voc_dim = 128   # embedding dim (lane-aligned)
    B = 8           # batch of context positions

    key = jax.random.PRNGKey(0)
    k_cb, k1, k2, k3, k4, kx = jax.random.split(key, 6)

    # Deterministic parameter init (mirrors nn.Embedding / nn.Linear shapes).
    codebook = jax.random.normal(k_cb, (voc_num, voc_dim), dtype=jnp.float32)
    w1 = jax.random.normal(k1, (voc_dim, voc_dim), dtype=jnp.float32) * 0.05
    w2 = jax.random.normal(k2, (voc_dim, voc_dim), dtype=jnp.float32) * 0.05
    w3 = jax.random.normal(k3, (voc_dim, voc_dim), dtype=jnp.float32) * 0.05
    w4 = jax.random.normal(k4, (voc_dim, voc_dim), dtype=jnp.float32) * 0.05

    # Deterministic index inputs (the four context-word id tensors).
    kx1, kx2, kx4, kx5 = jax.random.split(kx, 4)
    x1 = jax.random.randint(kx1, (B,), 0, voc_num, dtype=jnp.int32)
    x2 = jax.random.randint(kx2, (B,), 0, voc_num, dtype=jnp.int32)
    x4 = jax.random.randint(kx4, (B,), 0, voc_num, dtype=jnp.int32)
    x5 = jax.random.randint(kx5, (B,), 0, voc_num, dtype=jnp.int32)

    # One-time parameter fold (codebook @ W_c.T, stacked, bf16), cached after.
    table = prepare_params(codebook, w1, w2, w3, w4)

    out = jax.block_until_ready(cbow_forward(table, x1, x2, x4, x5))
    ref = cbow_reference(codebook, w1, w2, w3, w4, x1, x2, x4, x5)

    assert out.shape == (B, voc_dim)
    # bf16 folded table on the MXU (f32 accumulation): tolerance loosened vs.
    # the pure-f32 reference accordingly.
    assert jnp.allclose(out, ref, atol=2e-2, rtol=2e-2), "mismatch vs reference"

    print("KERNEL_OK")
</pallas_src>

<mosaic_0001>
module attributes {stable_mosaic.version = 11 : i64} {
  func.func @_cbow_onehot_kernel(%arg0: i32, %arg1: memref<8x4xi32, #tpu.memory_space<vmem>>, %arg2: memref<256x128xbf16, #tpu.memory_space<vmem>>, %arg3: memref<8x128xf32, #tpu.memory_space<vmem>>) attributes {dimension_semantics = [#tpu.dimension_semantics<parallel>], iteration_bounds = array<i64: 1>, scalar_prefetch = 0 : i64, scratch_operands = 0 : i64, tpu.core_type = #tpu.core_type<tc>, window_params = [{transform_indices = @transform_0, window_bounds = array<i64: 8, 4>}, {pipeline_mode = #tpu.pipeline_mode<synchronous>, transform_indices = @transform_1, window_bounds = array<i64: 256, 128>}, {transform_indices = @transform_2, window_bounds = array<i64: 8, 128>}]} {
    %0 = tpu.iota {dimensions = array<i32: 1>} : vector<8x256xi32>
    %c0 = arith.constant 0 : index
    %c0_0 = arith.constant 0 : index
    %1 = vector.load %arg1[%c0, %c0_0] : memref<8x4xi32, #tpu.memory_space<vmem>>, vector<8x4xi32>
    %cst = arith.constant 0.000000e+00 : f32
    %2 = vector.broadcast %cst : f32 to vector<8x256xf32>
    %3 = vector.extract_strided_slice %1 {offsets = [0, 0], sizes = [8, 1], strides = [1, 1]} : vector<8x4xi32> to vector<8x1xi32>
    %c0_i32 = arith.constant 0 : i32
    %4 = vector.broadcast %c0_i32 : i32 to vector<8x1xi32>
    %5 = arith.addi %3, %4 : vector<8x1xi32>
    %6 = vector.broadcast %5 : vector<8x1xi32> to vector<8x256xi32>
    %7 = arith.cmpi eq, %0, %6 : vector<8x256xi32>
    %8 = arith.extui %7 : vector<8x256xi1> to vector<8x256xi32>
    %9 = arith.sitofp %8 : vector<8x256xi32> to vector<8x256xf32>
    %10 = arith.addf %2, %9 : vector<8x256xf32>
    %11 = vector.extract_strided_slice %1 {offsets = [0, 1], sizes = [8, 1], strides = [1, 1]} : vector<8x4xi32> to vector<8x1xi32>
    %c64_i32 = arith.constant 64 : i32
    %12 = vector.broadcast %c64_i32 : i32 to vector<8x1xi32>
    %13 = arith.addi %11, %12 : vector<8x1xi32>
    %14 = vector.broadcast %13 : vector<8x1xi32> to vector<8x256xi32>
    %15 = arith.cmpi eq, %0, %14 : vector<8x256xi32>
    %16 = arith.extui %15 : vector<8x256xi1> to vector<8x256xi32>
    %17 = arith.sitofp %16 : vector<8x256xi32> to vector<8x256xf32>
    %18 = arith.addf %10, %17 : vector<8x256xf32>
    %19 = vector.extract_strided_slice %1 {offsets = [0, 2], sizes = [8, 1], strides = [1, 1]} : vector<8x4xi32> to vector<8x1xi32>
    %c128_i32 = arith.constant 128 : i32
    %20 = vector.broadcast %c128_i32 : i32 to vector<8x1xi32>
    %21 = arith.addi %19, %20 : vector<8x1xi32>
    %22 = vector.broadcast %21 : vector<8x1xi32> to vector<8x256xi32>
    %23 = arith.cmpi eq, %0, %22 : vector<8x256xi32>
    %24 = arith.extui %23 : vector<8x256xi1> to vector<8x256xi32>
    %25 = arith.sitofp %24 : vector<8x256xi32> to vector<8x256xf32>
    %26 = arith.addf %18, %25 : vector<8x256xf32>
    %27 = vector.extract_strided_slice %1 {offsets = [0, 3], sizes = [8, 1], strides = [1, 1]} : vector<8x4xi32> to vector<8x1xi32>
    %c192_i32 = arith.constant 192 : i32
    %28 = vector.broadcast %c192_i32 : i32 to vector<8x1xi32>
    %29 = arith.addi %27, %28 : vector<8x1xi32>
    %30 = vector.broadcast %29 : vector<8x1xi32> to vector<8x256xi32>
    %31 = arith.cmpi eq, %0, %30 : vector<8x256xi32>
    %32 = arith.extui %31 : vector<8x256xi1> to vector<8x256xi32>
    %33 = arith.sitofp %32 : vector<8x256xi32> to vector<8x256xf32>
    %34 = arith.addf %26, %33 : vector<8x256xf32>
    %35 = arith.truncf %34 : vector<8x256xf32> to vector<8x256xbf16>
    %c0_1 = arith.constant 0 : index
    %c0_2 = arith.constant 0 : index
    %36 = vector.load %arg2[%c0_1, %c0_2] : memref<256x128xbf16, #tpu.memory_space<vmem>>, vector<256x128xbf16>
    %cst_3 = arith.constant dense<0.000000e+00> : vector<8x128xf32>
    %37 = tpu.matmul %35, %36, %cst_3 {dimension_numbers = #tpu.dot_dimension_numbers<[1], [0], [0], [1], [0, 0, 1, 1], [], []>} : vector<8x256xbf16>, vector<256x128xbf16>, vector<8x128xf32> -> vector<8x128xf32>
    %c0_4 = arith.constant 0 : index
    %c0_5 = arith.constant 0 : index
    %38 = vector.load %arg3[%c0_4, %c0_5] : memref<8x128xf32, #tpu.memory_space<vmem>>, vector<8x128xf32>
    tpu.vector_store %arg3[%c0_4, %c0_5], %37 {strides = array<i32>} : memref<8x128xf32, #tpu.memory_space<vmem>>, vector<8x128xf32>,
    return
  }
  func.func @transform_0(%arg0: i32) -> (i32, i32) {
    %c0_i32 = arith.constant 0 : i32
    %c0_i32_0 = arith.constant 0 : i32
    return %arg0, %c0_i32 : i32, i32
  }
  func.func @transform_1(%arg0: i32) -> (i32, i32) {
    %c0_i32 = arith.constant 0 : i32
    %c0_i32_0 = arith.constant 0 : i32
    %c0_i32_1 = arith.constant 0 : i32
    return %c0_i32, %c0_i32_0 : i32, i32
  }
  func.func @transform_2(%arg0: i32) -> (i32, i32) {
    %c0_i32 = arith.constant 0 : i32
    %c0_i32_0 = arith.constant 0 : i32
    return %arg0, %c0_i32 : i32, i32
  }
}

</mosaic_0001>

<bundles_post_ra>
// kernel: cbow_forward.1
= control target key start
LH: loop header
LB: loop body
LE: loop exit
PB: predicated region body
PF: predicated region fallthrough
CT: control target
= control target key end

     0   :  { %7 = vsyncpa [#allocation3], 0  ;;  %s417_s0 = inlined_call_operand.vmem [shape: s32[8,4], index: 0, kind: input, shape index: {}]   ;;  %s418_s1 = inlined_call_operand.hbm [shape: bf16[256,128], index: 1, kind: input, shape index: {}]   ;;  %s419_s2 = inlined_call_operand.hbm [shape: f32[8,128], index: 2, kind: output, shape index: {}]  }
   0x1   :  { %8 = vsyncpa [#allocation4], 0  ;;  %s384_s9 = smov [#allocation2]  }
   0x2   :  { %s16_s10 = sshll.u32 %s384_s9, 4  ;;  %s17_s10 = int_to_ptr.vmem [resolvable:$true] %s16_s10 }
   0x3   :  { %s348_s11 = scalar_lea.vmem %s17_s10, 2048  ;;  %p353_p1 = scmp.lt.s32.totalorder %s17_s10, %s17_s10 }
   0x4   :  { %p349_p0 = scmp.ne.s32.totalorder %s17_s10, %s348_s11  ;;  %p354_p2 = scmp.lt.s32.totalorder %s348_s11, %s348_s11 }
   0x6   :  { %p355_p3 = por %p354_p2, %p353_p1 }
   0x8   :  { %p356_p4 = pnand %p355_p3, %p349_p0 }
   0xa   :  { %359 = shalt.err (!%p356_p4)
}
   0xb   :  { %s385_s12 = smov 64   ;;  %s386_s13 = smov 4  }
   0xc   :  { %22 = dma.hbm_to_vmem [thread:$0]  %s418_s1, 2048, %s17_s10, [#allocation3], %s385_s12, %s385_s12, %s386_s13  }
   0xd   :  { %380 = dma.done.wait [#allocation3], 2048  }
   0xe   :  { %381 = vsyncadd [#allocation3], 4294965248  ;;  %v387_v0 = vmov 0   ;;  %v388_v1 = vmov 2   ;;  %v30_v2 = vld [vmem:[%s417_s0] sm:$0xff]  ;;  %v324_v4 = vld [vmem:[#allocation2 + $0x78] sm:$0xff]   ;;  %v27_v24 = vlaneseq }
   0xf   :  { %319 = vset.pattern.permute.xlu0 %v387_v0  ;;  %321 = vset.pattern.permute.xlu1 %v388_v1  ;;  %v54_v3 = vadd.s32 128, %v30_v2  ;;  %v42_v5 = vadd.s32 64, %v30_v2  ;;  %v325_v6 = vld [vmem:[#allocation2 + $0x38] sm:$0xff]   ;;  %v326_v7 = vld [vmem:[#allocation2 + $0x70] sm:$0xff]   ;;  %v66_v8 = vadd.s32 192, %v30_v2  ;;  %v389_v10 = vmov 1  }
  0x10   :  { %32 = vperm.xlu0 %319, %v30_v2   ;;  %288 = vmatprep.subr.bf16.mxu0 %v324_v4  ;;  %v327_v9 = vld [vmem:[#allocation2 + $0x30] sm:$0xff]   ;;  %v328_v11 = vld [vmem:[#allocation2 + $0x68] sm:$0xff]   ;;  %v390_v12 = vmov 3   ;;  %v330_v14 = vld [vmem:[#allocation2 + $0x60] sm:$0xff]   ;;  %v28_v25 = vand.u32 127, %v27_v24  ;;  %v391_v30 = vmov 0.0  }
  0x11   :  { %56 = vperm.xlu1 %321, %v54_v3   ;;  %289 = vmatpush3.bf16.msra.mxu0 %v325_v6  ;;  %v329_v13 = vld [vmem:[#allocation2 + $0x28] sm:$0xff]   ;;  %v331_v15 = vld [vmem:[#allocation2 + $0x20] sm:$0xff]   ;;  %v332_v16 = vld [vmem:[#allocation2 + $0x58] sm:$0xff]   ;;  %s392_s0 = smov [#allocation5]  }
  0x12   :  { %290 = vmatprep.subr.bf16.mxu0 %v326_v7  ;;  %v333_v17 = vld [vmem:[#allocation2 + $0x18] sm:$0xff]   ;;  %v334_v18 = vld [vmem:[#allocation2 + $0x50] sm:$0xff]   ;;  %v336_v20 = vld [vmem:[#allocation2 + $0x48] sm:$0xff]   ;;  %v29_v26 = vadd.s32 128, %v28_v25  ;;  %s255_s1 = sshll.u32 %s392_s0, 4  ;;  %s256_s1 = int_to_ptr.vmem [resolvable:$true] %s255_s1 }
  0x13   :  { %v335_v19 = vld [vmem:[#allocation2 + $0x10] sm:$0xff]   ;;  %v337_v21 = vld [vmem:[#allocation2 + $0x8] sm:$0xff]   ;;  %v338_v22 = vld [vmem:[#allocation2 + $0x40] sm:$0xff]   ;;  %s360_s18 = scalar_lea.vmem %s256_s1, 128  ;;  %p365_p6 = scmp.lt.s32.totalorder %s256_s1, %s256_s1 }
  0x14   :  { %320 = vset.pattern.permute.xlu0 %v389_v10  ;;  %v339_v23 = vld [vmem:[#allocation2] sm:$0xff]   ;;  %p361_p5 = scmp.ne.s32.totalorder %s256_s1, %s360_s18  ;;  %p366_p7 = scmp.lt.s32.totalorder %s360_s18, %s360_s18 }
  0x15   :  { %44 = vperm.xlu0 %320, %v42_v5   ;;  %322 = vset.pattern.permute.xlu1 %v390_v12 }
  0x16   :  { %68 = vperm.xlu1 %322, %v66_v8   ;;  %291 = vmatpush3.bf16.msra.mxu0 %v327_v9  ;;  %p367_p8 = por %p366_p7, %p365_p6 }
  0x17   :  { %292 = vmatprep.subr.bf16.mxu0 %v328_v11 }
  0x18   :  { %p368_p9 = pnand %p367_p8, %p361_p5 }
  0x19   :  { %323 = vset.pattern.permute.xlu0 %v390_v12 }
  0x1a   :  { %293 = vmatpush3.bf16.msra.mxu0 %v329_v13 }
  0x1b   :  { %294 = vmatprep.subr.bf16.mxu0 %v330_v14 }
  0x1e   :  { %295 = vmatpush3.bf16.msra.mxu0 %v331_v15 }
  0x1f   :  { %296 = vmatprep.subr.bf16.mxu0 %v332_v16 }
  0x22   :  { %297 = vmatpush3.bf16.msra.mxu0 %v333_v17 }
  0x23   :  { %298 = vmatprep.subr.bf16.mxu0 %v334_v18 }
  0x26   :  { %299 = vmatpush3.bf16.msra.mxu0 %v335_v19 }
  0x27   :  { %300 = vmatprep.subr.bf16.mxu0 %v336_v20 }
  0x2a   :  { %301 = vmatpush3.bf16.msra.mxu0 %v337_v21 }
  0x2b   :  { %302 = vmatprep.subr.bf16.mxu0 %v338_v22 }
  0x2e   :  { %303 = vmatpush3.bf16.msra.mxu0 %v339_v23 }
  0x8b   :  { %v33_v27 = vpop.permute.xlu0 %32 }
  0x8c   :  { %v57_v28 = vpop.permute.xlu1 %56  ;;  %vm34_vm0 = vcmp.eq.s32.totalorder %v28_v25, %v33_v27  ;;  %vm35_vm1 = vcmp.eq.s32.totalorder %v29_v26, %v33_v27 }
  0x8d   :  { %vm58_vm2 = vcmp.eq.s32.totalorder %v28_v25, %v57_v28  ;;  %vm59_vm3 = vcmp.eq.s32.totalorder %v29_v26, %v57_v28  ;;  %v264_v31 = vsel %vm34_vm0, 1.0, %v391_v30  ;;  %v265_v32 = vsel %vm35_vm1, 1.0, %v391_v30 }
  0x8e   :  { %v268_v38 = vsel %vm58_vm2, 1.0, %v391_v30  ;;  %v269_v39 = vsel %vm59_vm3, 1.0, %v391_v30 }
  0x90   :  { %v45_v29 = vpop.permute.xlu0 %44 }
  0x91   :  { %vm46_vm4 = vcmp.eq.s32.totalorder %v28_v25, %v45_v29  ;;  %vm47_vm5 = vcmp.eq.s32.totalorder %v29_v26, %v45_v29  ;;  %v69_v35 = vpop.permute.xlu1 %68 }
  0x92   :  { %v266_v33 = vsel %vm46_vm4, 1.0, %v391_v30  ;;  %v267_v34 = vsel %vm47_vm5, 1.0, %v391_v30  ;;  %vm70_vm6 = vcmp.eq.s32.totalorder %v28_v25, %v69_v35  ;;  %vm71_vm7 = vcmp.eq.s32.totalorder %v29_v26, %v69_v35 }
  0x93   :  { %v52_v36 = vadd.f32 %v266_v33, %v264_v31  ;;  %v53_v37 = vadd.f32 %v267_v34, %v265_v32  ;;  %v270_v40 = vsel %vm70_vm6, 1.0, %v391_v30  ;;  %v271_v41 = vsel %vm71_vm7, 1.0, %v391_v30 }
  0x95   :  { %v64_v42 = vadd.f32 %v268_v38, %v52_v36  ;;  %v65_v43 = vadd.f32 %v269_v39, %v53_v37 }
  0x97   :  { %v76_v44 = vadd.f32 %v270_v40, %v64_v42  ;;  %v77_v45 = vadd.f32 %v271_v41, %v65_v43 }
  0x99   :  { %v78_v46 = vpack.c.bf16 %v76_v44, %v76_v44  ;;  %v79_v47 = vpack.c.bf16 %v77_v45, %v77_v45 }
  0x9b   :  { %240 = vmatprep.mubr.bf16.mxu0 %v79_v47 }
  0x9c   :  { %241 = vmatmul.mubr.bf16.vlgmr.msra.gmra.mxu0 %v78_v46 }
 0x15c   :  { %v304_v48 = vpop.f32.mrf.mxu0 }
 0x15e   :  { %v305_v49 = vpop.f32.mrf.mxu0 }
 0x15f   :  { %v306_v50 = vadd.f32 %v305_v49, %v304_v48 }
 0x160   :  { %v307_v51 = vpop.f32.mrf.mxu0 }
 0x161   :  { %248 = vst [vmem:[#allocation5] sm:$0xff] %v306_v50 }
 0x162   :  { %v308_v52 = vpop.f32.mrf.mxu0 }
 0x163   :  { %371 = shalt.err (!%p368_p9)
}
 0x164   :  { %258 = dma.vmem_to_hbm [thread:$0]  %s256_s1, 128, %s419_s2, [#allocation4]  }
 0x165   :  { %382 = dma.done.wait [#allocation4], 128  }
 0x166   :  { %383 = vsyncadd [#allocation4], 4294967168 }
 0x167   :  { %262 = vsyncpa [#allocation3], 1 }
 0x168   :  { %263 = vsyncpa [#allocation4], 1 }

</bundles_post_ra>
